<compile_context>
chip_gen: v7x
topology: tpu7x:2x2x1
jax: 0.10.0
libtpu: 0.0.40
codegen_flags: <defaults>
</compile_context>

<pallas_src>
import functools

import jax
import jax.numpy as jnp
from jax.experimental import pallas as pl
from jax.experimental.pallas import tpu as pltpu


def _round_up(x, m):
    return ((x + m - 1) // m) * m


def roi_head_kernel(x_ref, w1_ref, b1_ref, w2_ref, b2_ref, out_ref, h_ref,
                    *, k1_tiles):
    """Fused: out = relu(relu(x @ W1 + b1) @ W2 + b2), phased over grid axis 1."""
    j = pl.program_id(1)

    # ---- fc1: accumulate over K tiles into the resident f32 scratch --------
    @pl.when(j == 0)
    def _init():
        h_ref[...] = jnp.zeros_like(h_ref)

    @pl.when(j < k1_tiles)
    def _fc1_step():
        h_ref[...] += jnp.dot(x_ref[...], w1_ref[...],
                              preferred_element_type=jnp.float32)

    # fc1 epilogue: bias + ReLU; h stays in VMEM (never written to HBM).
    @pl.when(j == k1_tiles - 1)
    def _fc1_epilogue():
        h_ref[...] = jnp.maximum(h_ref[...] + b1_ref[...], 0.0)

    # ---- fc2: one output-column tile per phase-2 step ----------------------
    @pl.when(j >= k1_tiles)
    def _fc2_step():
        h = h_ref[...].astype(w2_ref.dtype)        # deliberate bf16 activation
        y = jnp.dot(h, w2_ref[...], preferred_element_type=jnp.float32)
        y = y + b2_ref[...]
        out_ref[...] = jnp.maximum(y, 0.0).astype(out_ref.dtype)


def vgg_roi_head(x_nchw, w1, b1, w2, b2, *, weight_dtype=jnp.bfloat16):
    """x_nchw: (N, C, H, W); w1: (D_in, R); b1: (R,); w2: (R, R); b2: (R,)."""
    n = x_nchw.shape[0]
    d_in = x_nchw.shape[1] * x_nchw.shape[2] * x_nchw.shape[3]
    rep = w1.shape[1]
    out_dtype = x_nchw.dtype
    assert rep % 128 == 0, "representation_size must be a multiple of 128"

    # --- tile plan (valid for v5e/v6e/v7x; sized for v7x's 64 MiB VMEM) -----
    d_pad = _round_up(d_in, 256)                  # lane/MXU-aligned K
    tk1 = 512 if d_pad % 512 == 0 else 256        # fc1 K tile
    tm = min(128, _round_up(n, 8))                # M tile (128-multiples)
    m_pad = _round_up(n, tm)
    tn2 = min(512, rep)                           # fc2 output-column tile
    assert rep % tn2 == 0

    k1_tiles = d_pad // tk1
    n2_tiles = rep // tn2
    m_tiles = m_pad // tm
    last_k = k1_tiles - 1

    # --- glue: flatten exactly like torch.flatten(x, 1), pad, cast ----------
    x_flat = x_nchw.reshape(n, d_in)
    x_p = jnp.zeros((m_pad, d_pad), weight_dtype).at[:n, :d_in].set(
        x_flat.astype(weight_dtype))
    w1_p = jnp.zeros((d_pad, rep), weight_dtype).at[:d_in, :].set(
        w1.astype(weight_dtype))
    w2_p = w2.astype(weight_dtype)
    b1_2d = b1.reshape(1, rep).astype(jnp.float32)
    b2_2d = b2.reshape(1, rep).astype(jnp.float32)

    kernel = functools.partial(roi_head_kernel, k1_tiles=k1_tiles)

    cost = pl.CostEstimate(
        flops=2 * m_pad * (d_pad * rep + rep * rep),
        transcendentals=0,
        bytes_accessed=(x_p.size * x_p.dtype.itemsize
                        + w1_p.size * w1_p.dtype.itemsize
                        + w2_p.size * w2_p.dtype.itemsize
                        + m_pad * rep * jnp.dtype(out_dtype).itemsize),
    )

    out_p = pl.pallas_call(
        kernel,
        out_shape=jax.ShapeDtypeStruct((m_pad, rep), out_dtype),
        grid_spec=pltpu.PrefetchScalarGridSpec(
            num_scalar_prefetch=0,
            grid=(m_tiles, k1_tiles + n2_tiles),
            in_specs=[
                # x: streamed over K during phase 1, parked during phase 2.
                pl.BlockSpec((tm, tk1),
                             lambda m, j: (m, jnp.minimum(j, last_k))),
                # W1: (K-tile, full REP) slab, streamed over K (bf16).
                pl.BlockSpec((tk1, rep),
                             lambda m, j: (jnp.minimum(j, last_k), 0)),
                # b1: whole row, fetched once per M tile.
                pl.BlockSpec((1, rep), lambda m, j: (0, 0)),
                # W2: (full REP, N-tile) column slab, streamed in phase 2.
                pl.BlockSpec((rep, tn2),
                             lambda m, j: (0, jnp.maximum(j - k1_tiles, 0))),
                # b2: matching column tile.
                pl.BlockSpec((1, tn2),
                             lambda m, j: (0, jnp.maximum(j - k1_tiles, 0))),
            ],
            out_specs=pl.BlockSpec(
                (tm, tn2), lambda m, j: (m, jnp.maximum(j - k1_tiles, 0))),
            scratch_shapes=[pltpu.VMEM((tm, rep), jnp.float32)],
        ),
        compiler_params=pltpu.CompilerParams(
            dimension_semantics=("parallel", "arbitrary"),
            vmem_limit_bytes=48 * 1024 * 1024,
        ),
        cost_estimate=cost,
    )(x_p, w1_p, b1_2d, w2_p, b2_2d)

    return out_p[:n]


def reference(x_nchw, w1, b1, w2, b2):
    x = x_nchw.reshape(x_nchw.shape[0], -1)
    h = jnp.maximum(x @ w1 + b1, 0.0)
    return jnp.maximum(h @ w2 + b2, 0.0)


if __name__ == "__main__":
    # Small shapes consistent with the module's forward:
    #   real VGG head: x = (N, 512, 7, 7) -> 25088 -> 4096 -> 4096
    #   synthetic:     x = (2, 4, 7, 7)   ->   196 ->  128 ->  128
    N, C, H, W = 2, 4, 7, 7
    D_IN = C * H * W          # 196
    REP = 128                 # representation_size (synthetic)

    key = jax.random.PRNGKey(0)
    kx, k1, kb1, k2, kb2 = jax.random.split(key, 5)

    x = jax.random.normal(kx, (N, C, H, W), dtype=jnp.float32)
    # Deterministic parameter init (shapes follow nn.Linear, stored transposed).
    w1 = jax.random.normal(k1, (D_IN, REP), dtype=jnp.float32) * 0.02
    b1 = jax.random.normal(kb1, (REP,), dtype=jnp.float32) * 0.01
    w2 = jax.random.normal(k2, (REP, REP), dtype=jnp.float32) * 0.02
    b2 = jax.random.normal(kb2, (REP,), dtype=jnp.float32) * 0.01

    out = vgg_roi_head(x, w1, b1, w2, b2)
    out = jax.block_until_ready(out)

    ref = reference(x, w1, b1, w2, b2)
    assert out.shape == (N, REP), out.shape
    # bf16 weight/activation streaming vs f32 reference -> loose-ish tolerance.
    assert jnp.allclose(out, ref, atol=2e-2, rtol=2e-2), "mismatch vs reference"

    print("KERNEL_OK")
</pallas_src>

<mosaic_0001>
module attributes {stable_mosaic.version = 11 : i64} {
  func.func @roi_head_kernel(%arg0: i32, %arg1: i32, %arg2: memref<8x256xbf16, #tpu.memory_space<vmem>>, %arg3: memref<256x128xbf16, #tpu.memory_space<vmem>>, %arg4: memref<1x128xf32, #tpu.memory_space<vmem>>, %arg5: memref<128x128xbf16, #tpu.memory_space<vmem>>, %arg6: memref<1x128xf32, #tpu.memory_space<vmem>>, %arg7: memref<8x128xf32, #tpu.memory_space<vmem>>, %arg8: memref<8x128xf32, #tpu.memory_space<vmem>>) attributes {dimension_semantics = [#tpu.dimension_semantics<parallel>, #tpu.dimension_semantics<arbitrary>], iteration_bounds = array<i64: 1, 2>, scalar_prefetch = 0 : i64, scratch_operands = 1 : i64, tpu.core_type = #tpu.core_type<tc>, window_params = [{transform_indices = @transform_0, window_bounds = array<i64: 8, 256>}, {transform_indices = @transform_1, window_bounds = array<i64: 256, 128>}, {pipeline_mode = #tpu.pipeline_mode<synchronous>, transform_indices = @transform_2, window_bounds = array<i64: 1, 128>}, {transform_indices = @transform_3, window_bounds = array<i64: 128, 128>}, {transform_indices = @transform_4, window_bounds = array<i64: 1, 128>}, {transform_indices = @transform_5, window_bounds = array<i64: 8, 128>}]} {
    %c0_i32 = arith.constant 0 : i32
    %0 = arith.cmpi eq, %arg1, %c0_i32 : i32
    %1 = arith.extui %0 : i1 to i32
    %c0_i32_0 = arith.constant 0 : i32
    %2 = arith.cmpi ne, %1, %c0_i32_0 : i32
    scf.if %2 {
      %cst = arith.constant 0.000000e+00 : f32
      %12 = vector.broadcast %cst : f32 to vector<8x128xf32>
      %c0 = arith.constant 0 : index
      %c0_6 = arith.constant 0 : index
      %13 = vector.load %arg8[%c0, %c0_6] : memref<8x128xf32, #tpu.memory_space<vmem>>, vector<8x128xf32>
      tpu.vector_store %arg8[%c0, %c0_6], %12 {strides = array<i32>} : memref<8x128xf32, #tpu.memory_space<vmem>>, vector<8x128xf32>,
    } else {
    }
    %c1_i32 = arith.constant 1 : i32
    %3 = arith.cmpi slt, %arg1, %c1_i32 : i32
    %4 = arith.extui %3 : i1 to i32
    %c0_i32_1 = arith.constant 0 : i32
    %5 = arith.cmpi ne, %4, %c0_i32_1 : i32
    scf.if %5 {
      %c0 = arith.constant 0 : index
      %c0_6 = arith.constant 0 : index
      %12 = vector.load %arg8[%c0, %c0_6] : memref<8x128xf32, #tpu.memory_space<vmem>>, vector<8x128xf32>
      %c0_7 = arith.constant 0 : index
      %c0_8 = arith.constant 0 : index
      %13 = vector.load %arg2[%c0_7, %c0_8] : memref<8x256xbf16, #tpu.memory_space<vmem>>, vector<8x256xbf16>
      %c0_9 = arith.constant 0 : index
      %c0_10 = arith.constant 0 : index
      %14 = vector.load %arg3[%c0_9, %c0_10] : memref<256x128xbf16, #tpu.memory_space<vmem>>, vector<256x128xbf16>
      %cst = arith.constant dense<0.000000e+00> : vector<8x128xf32>
      %15 = tpu.matmul %13, %14, %cst {dimension_numbers = #tpu.dot_dimension_numbers<[1], [0], [0], [1], [0, 0, 1, 1], [], []>} : vector<8x256xbf16>, vector<256x128xbf16>, vector<8x128xf32> -> vector<8x128xf32>
      %16 = arith.addf %12, %15 : vector<8x128xf32>
      %c0_11 = arith.constant 0 : index
      %c0_12 = arith.constant 0 : index
      %17 = vector.load %arg8[%c0_11, %c0_12] : memref<8x128xf32, #tpu.memory_space<vmem>>, vector<8x128xf32>
      tpu.vector_store %arg8[%c0_11, %c0_12], %16 {strides = array<i32>} : memref<8x128xf32, #tpu.memory_space<vmem>>, vector<8x128xf32>,
    } else {
    }
    %c0_i32_2 = arith.constant 0 : i32
    %6 = arith.cmpi eq, %arg1, %c0_i32_2 : i32
    %7 = arith.extui %6 : i1 to i32
    %c0_i32_3 = arith.constant 0 : i32
    %8 = arith.cmpi ne, %7, %c0_i32_3 : i32
    scf.if %8 {
      %c0 = arith.constant 0 : index
      %c0_6 = arith.constant 0 : index
      %12 = vector.load %arg8[%c0, %c0_6] : memref<8x128xf32, #tpu.memory_space<vmem>>, vector<8x128xf32>
      %c0_7 = arith.constant 0 : index
      %c0_8 = arith.constant 0 : index
      %13 = vector.load %arg4[%c0_7, %c0_8] : memref<1x128xf32, #tpu.memory_space<vmem>>, vector<1x128xf32>
      %14 = vector.broadcast %13 : vector<1x128xf32> to vector<8x128xf32>
      %15 = arith.addf %12, %14 : vector<8x128xf32>
      %cst = arith.constant 0.000000e+00 : f32
      %16 = vector.broadcast %cst : f32 to vector<8x128xf32>
      %17 = arith.maximumf %15, %16 : vector<8x128xf32>
      %c0_9 = arith.constant 0 : index
      %c0_10 = arith.constant 0 : index
      %18 = vector.load %arg8[%c0_9, %c0_10] : memref<8x128xf32, #tpu.memory_space<vmem>>, vector<8x128xf32>
      tpu.vector_store %arg8[%c0_9, %c0_10], %17 {strides = array<i32>} : memref<8x128xf32, #tpu.memory_space<vmem>>, vector<8x128xf32>,
    } else {
    }
    %c1_i32_4 = arith.constant 1 : i32
    %9 = arith.cmpi sge, %arg1, %c1_i32_4 : i32
    %10 = arith.extui %9 : i1 to i32
    %c0_i32_5 = arith.constant 0 : i32
    %11 = arith.cmpi ne, %10, %c0_i32_5 : i32
    scf.if %11 {
      %c0 = arith.constant 0 : index
      %c0_6 = arith.constant 0 : index
      %12 = vector.load %arg8[%c0, %c0_6] : memref<8x128xf32, #tpu.memory_space<vmem>>, vector<8x128xf32>
      %13 = arith.truncf %12 : vector<8x128xf32> to vector<8x128xbf16>
      %c0_7 = arith.constant 0 : index
      %c0_8 = arith.constant 0 : index
      %14 = vector.load %arg5[%c0_7, %c0_8] : memref<128x128xbf16, #tpu.memory_space<vmem>>, vector<128x128xbf16>
      %cst = arith.constant dense<0.000000e+00> : vector<8x128xf32>
      %15 = tpu.matmul %13, %14, %cst {dimension_numbers = #tpu.dot_dimension_numbers<[1], [0], [0], [1], [0, 0, 1, 1], [], []>} : vector<8x128xbf16>, vector<128x128xbf16>, vector<8x128xf32> -> vector<8x128xf32>
      %c0_9 = arith.constant 0 : index
      %c0_10 = arith.constant 0 : index
      %16 = vector.load %arg6[%c0_9, %c0_10] : memref<1x128xf32, #tpu.memory_space<vmem>>, vector<1x128xf32>
      %17 = vector.broadcast %16 : vector<1x128xf32> to vector<8x128xf32>
      %18 = arith.addf %15, %17 : vector<8x128xf32>
      %cst_11 = arith.constant 0.000000e+00 : f32
      %19 = vector.broadcast %cst_11 : f32 to vector<8x128xf32>
      %20 = arith.maximumf %18, %19 : vector<8x128xf32>
      %c0_12 = arith.constant 0 : index
      %c0_13 = arith.constant 0 : index
      %21 = vector.load %arg7[%c0_12, %c0_13] : memref<8x128xf32, #tpu.memory_space<vmem>>, vector<8x128xf32>
      tpu.vector_store %arg7[%c0_12, %c0_13], %20 {strides = array<i32>} : memref<8x128xf32, #tpu.memory_space<vmem>>, vector<8x128xf32>,
    } else {
    }
    return
  }
  func.func @transform_0(%arg0: i32, %arg1: i32) -> (i32, i32) {
    %c0_i32 = arith.constant 0 : i32
    %0 = arith.minsi %arg1, %c0_i32 : i32
    %c0_i32_0 = arith.constant 0 : i32
    return %arg0, %0 : i32, i32
  }
  func.func @transform_1(%arg0: i32, %arg1: i32) -> (i32, i32) {
    %c0_i32 = arith.constant 0 : i32
    %0 = arith.minsi %arg1, %c0_i32 : i32
    %c0_i32_0 = arith.constant 0 : i32
    %c0_i32_1 = arith.constant 0 : i32
    return %0, %c0_i32_0 : i32, i32
  }
  func.func @transform_2(%arg0: i32, %arg1: i32) -> (i32, i32) {
    %c0_i32 = arith.constant 0 : i32
    %c0_i32_0 = arith.constant 0 : i32
    %c0_i32_1 = arith.constant 0 : i32
    return %c0_i32, %c0_i32_0 : i32, i32
  }
  func.func @transform_3(%arg0: i32, %arg1: i32) -> (i32, i32) {
    %c1_i32 = arith.constant 1 : i32
    %0 = arith.subi %arg1, %c1_i32 : i32
    %c0_i32 = arith.constant 0 : i32
    %1 = arith.maxsi %0, %c0_i32 : i32
    %c0_i32_0 = arith.constant 0 : i32
    %c0_i32_1 = arith.constant 0 : i32
    return %c0_i32_0, %1 : i32, i32
  }
  func.func @transform_4(%arg0: i32, %arg1: i32) -> (i32, i32) {
    %c1_i32 = arith.constant 1 : i32
    %0 = arith.subi %arg1, %c1_i32 : i32
    %c0_i32 = arith.constant 0 : i32
    %1 = arith.maxsi %0, %c0_i32 : i32
    %c0_i32_0 = arith.constant 0 : i32
    %c0_i32_1 = arith.constant 0 : i32
    return %c0_i32_0, %1 : i32, i32
  }
  func.func @transform_5(%arg0: i32, %arg1: i32) -> (i32, i32) {
    %c1_i32 = arith.constant 1 : i32
    %0 = arith.subi %arg1, %c1_i32 : i32
    %c0_i32 = arith.constant 0 : i32
    %1 = arith.maxsi %0, %c0_i32 : i32
    %c0_i32_0 = arith.constant 0 : i32
    return %arg0, %1 : i32, i32
  }
}

</mosaic_0001>

<bundles_post_ra>
// kernel: tpu_custom_call.1
= control target key start
LH: loop header
LB: loop body
LE: loop exit
PB: predicated region body
PF: predicated region fallthrough
CT: control target
= control target key end

     0   :  { %10 = vsyncpa [#allocation4], 0  ;;  %s1656_s0 = inlined_call_operand.hbm [shape: bf16[8,256], index: 0, kind: input, shape index: {}]   ;;  %s1657_s1 = inlined_call_operand.hbm [shape: bf16[256,128], index: 1, kind: input, shape index: {}]   ;;  %s1658_s2 = inlined_call_operand.vmem [shape: f32[1,128], index: 2, kind: input, shape index: {}]   ;;  %s1659_s3 = inlined_call_operand.hbm [shape: bf16[128,128], index: 3, kind: input, shape index: {}]   ;;  %s1660_s4 = inlined_call_operand.vmem [shape: f32[1,128], index: 4, kind: input, shape index: {}]   ;;  %s1661_s5 = inlined_call_operand.hbm [shape: f32[8,128], index: 5, kind: output, shape index: {}]  }
   0x1   :  { %12 = vsyncpa [#allocation4 + $0x1], 0 }
   0x2   :  { %13 = vsyncpa [#allocation7], 0 }
   0x3   :  { %15 = vsyncpa [#allocation7 + $0x1], 0 }
   0x4   :  { %16 = vsyncpa [#allocation5], 0 }
   0x5   :  { %18 = vsyncpa [#allocation5 + $0x1], 0  ;;  %s1369_s18 = smov 0   ;;  %s1371_s19 = smov 0  }
   0x6   :  { %s1373_s20 = smov 0   ;;  %s1375_s21 = smov 0  }
   0x7   :  { %s1377_s22 = smov 0   ;;  %s1379_s23 = smov 0  }
   0x8   :  { %s1381_s24 = smov 0  }
   0x9 LB: > { %s1403_s25 = sadd.s32 4294967295, %s1328_s24   ;;  %s33_s26 = sadd.s32 1, %s1324_s23  ;;  %s1328_s24 = sphi %s1381_s24, %s24_s24   ;;  %s1324_s23 = sphi %s1379_s23, %s1692_s23   ;;  %s1320_s22 = sphi %s1377_s22, %s1691_s22   ;;  %s1316_s21 = sphi %s1375_s21, %s1646_s21   ;;  %s1312_s20 = sphi %s1373_s20, %s1690_s20   ;;  %s1308_s19 = sphi %s1371_s19, %s1641_s19   ;;  %s1304_s18 = sphi %s1369_s18, %s1689_s18  }
   0xa   : > { %p34_p0 = scmp.ge.s32.totalorder %s33_s26, 2  ;;  %p1300_p1 = scmp.ne.s32.totalorder %s1316_s21, 0 }
   0xb   : > { %p1664_p2 = scmp.eq.s32.totalorder %s1328_s24, 0  ;;  %p62_p3 = scmp.ne.s32.totalorder %s1316_s21, %s1312_s20 }
   0xc   : > { %s1694_s26 = smov (%p34_p0, %s33_s26), 0  ;;  %p1663_p4 = scmp.eq.s32.totalorder %s1403_s25, 0 }
   0xd   : > { %p58_p5 = por %p1300_p1, %p1664_p2  ;;  %p1662_p8 = scmp.lt.s32.totalorder %s1328_s24, 2 }
   0xe   : > { %p1416_p6 = por %p1663_p4, %p62_p3  ;;  %s261_s28 = sand.u32 1, %s1328_s24  }
   0xf   : > { %p1425_p9 = pnand %p1662_p8, %p58_p5  ;;  %s1330_s30 = smov [#allocation6]  }
  0x10   : > { %s1670_s27 = scalar_select %p1416_p6, 1, 0 }
  0x11   : > { %s274_s6 = sshll.u32 %s1330_s30, 4  ;;  %s1432_s7 = scalar_lea.sflag [#allocation7], %s261_s28  ;;  %s1429_s6 = int_to_ptr.vmem [resolvable:$true] %s274_s6 }
  0x12   : > { %s1130_s10 = scalar_lea.hbm %s1657_s1, 2048  ;;  %p1132_p12 = pneg %p1425_p9 }
  0x13   : > { %p1131_p11 = scmp.ne.s32.totalorder %s1657_s1, %s1130_s10  ;;  %p1137_p1 = scmp.lt.u32.totalorder %s1130_s10, %s1130_s10 }
  0x14   : > { %p1139_p3 = scmp.lt.u32.totalorder %s1130_s10, %s1657_s1 }
  0x15   : > { %p1133_p13 = pnand %p1132_p12, %p1131_p11 }
  0x16   : > { %p1140_p5 = por %p1139_p3, %p1137_p1 }
  0x17   : > { %p1134_p0 = pneg %p1133_p13 }
  0x19   : > { %p1141_p7 = pnand %p1140_p5, %p1134_p0 }
  0x1b   : > { %1144 = shalt.err (!%p1141_p7)
}
  0x1c   : > { %s1145_s15 = scalar_lea.vmem %s1429_s6, 2048  ;;  %s1152_s16 = scalar_lea.vmem %s1429_s6, 4096 }
  0x1d   : > { %p1146_p8 = scmp.ne.s32.totalorder %s1429_s6, %s1145_s15  ;;  %p1153_p13 = scmp.lt.s32.totalorder %s1429_s6, %s1429_s6 }
  0x1e   : > { %p1154_p2 = scmp.lt.s32.totalorder %s1152_s16, %s1145_s15 }
  0x1f   : > { %p1148_p4 = pnand %p1146_p8, %p1132_p12 }
  0x20   : > { %p1155_p10 = por %p1154_p2, %p1153_p13 }
  0x21   : > { %p1149_p11 = pneg %p1148_p4 }
  0x23   : > { %p1156_p6 = pnand %p1155_p10, %p1149_p11 }
  0x25   : > { %1159 = shalt.err (!%p1156_p6)
}
  0x26   : > { %s1666_s17 = smov 64   ;;  %s1332_s20 = smov 4  }
  0x27   : > { %1017 = dma.hbm_to_vmem [thread:$0]  (!%p1425_p9), %s1657_s1, 2048, %s1429_s6, %s1432_s7, %s1666_s17, %s1666_s17, %s1332_s20  }
  0x28   : > { %p317_p4 = scmp.lt.s32.totalorder %s1328_s24, 3  ;;  %p1672_p2 = scmp.ge.s32.totalorder %s1328_s24, 1 }
  0x29   : > { %s1333_s9 = smov [#allocation3]   ;;  %s1160_s13 = scalar_lea.hbm %s1656_s0, 128 }
  0x2a   : > { %p1469_p7 = pnand %p1672_p2, %p317_p4  ;;  %s254_s10 = sshll.u32 %s1333_s9, 4  ;;  %s255_s10 = int_to_ptr.vmem [resolvable:$true] %s254_s10 }
  0x2b   : > { %p1161_p6 = scmp.ne.s32.totalorder %s1656_s0, %s1160_s13  ;;  %p1167_p0 = scmp.lt.u32.totalorder %s1160_s13, %s1160_s13 }
  0x2c   : > { %s1673_s8 = scalar_select %p1469_p7, 1, 0 }
  0x2d   : > { %p1163_p8 = pnand %p1161_p6, %p1132_p12  ;;  %p1169_p1 = scmp.lt.u32.totalorder %s1160_s13, %s1656_s0 }
  0x2f   : > { %p1164_p10 = pneg %p1163_p8  ;;  %p1170_p3 = por %p1169_p1, %p1167_p0 }
  0x31   : > { %p1171_p5 = pnand %p1170_p3, %p1164_p10 }
  0x33   : > { %1174 = shalt.err (!%p1171_p5)
}
  0x34   : > { %s1175_s28 = scalar_lea.vmem %s255_s10, 128  ;;  %s1182_s30 = scalar_lea.vmem %s255_s10, 256 }
  0x35   : > { %p1176_p11 = scmp.ne.s32.totalorder %s255_s10, %s1175_s28  ;;  %p1183_p2 = scmp.lt.s32.totalorder %s255_s10, %s255_s10 }
  0x36   : > { %p1184_p7 = scmp.lt.s32.totalorder %s1182_s30, %s1175_s28 }
  0x37   : > { %p1178_p13 = pnand %p1176_p11, %p1132_p12 }
  0x38   : > { %p1185_p6 = por %p1184_p7, %p1183_p2 }
  0x39   : > { %p1179_p4 = pneg %p1178_p13 }
  0x3b   : > { %p1186_p8 = pnand %p1185_p6, %p1179_p4 }
  0x3d   : > { %1189 = shalt.err (!%p1186_p8)
}
  0x3e   : > { %1014 = dma.hbm_to_vmem [thread:$0]  (!%p1425_p9), %s1656_s0, 128, %s255_s10, [#allocation4]  }
  0x3f   : > { %s884_s12 = sadd.s32 4294967294, %s1328_s24   ;;  %p1301_p12 = scmp.ne.s32.totalorder %s1308_s19, 0 }
  0x40   : > { %p1674_p10 = scmp.eq.s32.totalorder %s1328_s24, 0  ;;  %p145_p0 = scmp.ne.s32.totalorder %s1308_s19, %s1304_s18 }
  0x41   : > { %p209_p1 = scmp.eq.s32.totalorder %s1403_s25, 1  ;;  %p1675_p3 = scmp.eq.s32.totalorder %s1403_s25, 0 }
  0x42   : > { %p141_p7 = por %p1301_p12, %p1674_p10  ;;  %p215_p13 = scmp.eq.s32.totalorder %s884_s12, 1 }
  0x43   : > { %p1502_p5 = por %p145_p0, %p1675_p3  ;;  %p1506_p11 = por %p1301_p12, %p209_p1 }
  0x44   : > { %p1510_p4 = por %p215_p13, %p145_p0  ;;  %s1334_s10 = smov [#allocation8]  }
  0x45   : > { %s1676_s29 = scalar_select %p1502_p5, 1, 0 }
  0x46   : > { %s1677_s13 = scalar_select %p1506_p11, 1, 0 }
  0x47   : > { %s1678_s14 = scalar_select %p1510_p4, 1, 0 }
  0x48   : > { %s297_s15 = sshll.u32 %s1334_s10, 4  ;;  %p1679_p9 = scmp.lt.s32.totalorder %s1328_s24, 2  ;;  %s298_s15 = int_to_ptr.vmem [resolvable:$true] %s297_s15 }
  0x49   : > { %s1190_s30 = scalar_lea.hbm %s1659_s3, 1024 }
  0x4a   : > { %p1516_p2 = pnand %p1679_p9, %p141_p7  ;;  %p1191_p6 = scmp.ne.s32.totalorder %s1659_s3, %s1190_s30 }
  0x4b   : > { %p1197_p0 = scmp.lt.u32.totalorder %s1190_s30, %s1190_s30  ;;  %p1199_p7 = scmp.lt.u32.totalorder %s1190_s30, %s1659_s3 }
  0x4c   : > { %s1680_s6 = scalar_select %p1516_p2, 1, 0 }
  0x4d   : > { %p1192_p8 = pneg %p1516_p2  ;;  %p1200_p1 = por %p1199_p7, %p1197_p0 }
  0x4f   : > { %p1193_p12 = pnand %p1192_p8, %p1191_p6 }
  0x51   : > { %p1194_p10 = pneg %p1193_p12 }
  0x53   : > { %p1201_p3 = pnand %p1200_p1, %p1194_p10 }
  0x55   : > { %1204 = shalt.err (!%p1201_p3)
}
  0x56   : > { %s1205_s17 = scalar_lea.vmem %s298_s15, 1024  ;;  %s1212_s16 = scalar_lea.vmem %s298_s15, 2048 }
  0x57   : > { %p1206_p13 = scmp.ne.s32.totalorder %s298_s15, %s1205_s17  ;;  %p1213_p11 = scmp.lt.s32.totalorder %s298_s15, %s298_s15 }
  0x58   : > { %p1214_p5 = scmp.lt.s32.totalorder %s1212_s16, %s1205_s17 }
  0x59   : > { %p1208_p9 = pnand %p1206_p13, %p1192_p8 }
  0x5a   : > { %p1215_p2 = por %p1214_p5, %p1213_p11 }
  0x5b   : > { %p1209_p4 = pneg %p1208_p9 }
  0x5d   : > { %p1216_p6 = pnand %p1215_p2, %p1209_p4 }
  0x5f   : > { %1219 = shalt.err (!%p1216_p6)
}
  0x60   : > { %p1681_p12 = scmp.ne.s32.totalorder %s1680_s6, 0  ;;  %s1682_s28 = smov 64  }
  0x61   : > { %p1683_p10 = scmp.ne.s32.totalorder %s1673_s8, 0 }
  0x62   : > { %1020 = dma.hbm_to_vmem [thread:$0]  (!%p1681_p12), %s1659_s3, 1024, %s298_s15, %s1432_s7, %s1682_s28, %s1682_s28, %s1332_s20  }
  0x63   : > { %321 = sbr.rel (%p1683_p10) target bundleno = 665 (0x299), region = 40  ;;  %s323_s11 = sand.u32 (!%p1683_p10), 1, %s1316_s21  }
  0x64   : > { %s903_s17 = sshll.u32 (!%p1683_p10), %s323_s11, 3  ;;  %s324_s12 = scalar_lea.sflag (!%p1683_p10), [#allocation4], %s323_s11 }
  0x65   : > { %s1543_s10 = scalar_lea.vmem (!%p1683_p10), [#allocation3], %s903_s17  ;;  %p1684_p5 = scmp.ne.s32.totalorder (!%p1683_p10), %s1670_s27, 0 }
  0x6a   : > { %1285 = dma.done.wait (%p1684_p5), %s324_s12, 128  }
  0x6b   : > { %1287 = vsyncadd (%p1684_p5), %s324_s12, 4294967168  ;;  %s332_s6 = sand.u32 1, %s1403_s25   ;;  %s904_s16 = sshll.u32 %s323_s11, 7 }
  0x6c   : > { %s333_s7 = scalar_lea.sflag [#allocation7], %s332_s6  ;;  %s1550_s20 = scalar_lea.vmem [#allocation6], %s904_s16 }
  0x6d   : > { %1289 = dma.done.wait (%p1684_p5), %s333_s7, 2048  }
  0x6e   : > { %1291 = vsyncadd (%p1684_p5), %s333_s7, 4294965248  ;;  %s1557_s8 = sand.u32 1, %s1308_s19   ;;  %p1685_p11 = scmp.ne.s32.totalorder %s1676_s29, 0 }
  0x6f   : > { %s905_s15 = sshll.u32 %s1557_s8, 6 }
  0x70   : > { %s1560_s28 = scalar_lea.vmem [#allocation8], %s905_s15 }
  0x71   : > { %1293 = dma.done.wait (%p1685_p11), %s333_s7, 1024  }
  0x72   : > { %1295 = vsyncadd (%p1685_p11), %s333_s7, 4294966272  ;;  %s906_s25 = sshll.u32 %s1557_s8, 3  ;;  %p913_p4 = scmp.ne.s32.totalorder %s1320_s22, 0 }
  0x73   : > { %s1567_s30 = scalar_lea.vmem [#allocation9], %s906_s25  ;;  %v1335_v0 = vmov (!%p913_p4), 0.0  }
  0x74   : > { %413 = sbr.rel (%p913_p4) target bundleno = 123 (0x7b), region = 56  ;;  %414 = vst [vmem:[#allocation2] sm:$0xff] (!%p913_p4), %v1335_v0 }
  0x7b PF: > { %p914_p2 = scmp.ge.s32.totalorder %s1320_s22, 1 }
  0x7c   : > { %v1104_v1 = vld [vmem:[%s1550_s20 + $0x40] sm:$0xff] (!%p914_p2)   ;;  %v1106_v3 = vld [vmem:[%s1550_s20 + $0x48] sm:$0xff] (!%p914_p2)   ;;  %v1108_v5 = vld [vmem:[%s1550_s20 + $0x50] sm:$0xff] (!%p914_p2)  }
  0x7d   : > { %418 = sbr.rel (%p914_p2) target bundleno = 375 (0x177), region = 60  ;;  %v1105_v2 = vld [vmem:[%s1550_s20] sm:$0xff] (!%p914_p2)   ;;  %952 = vmatprep.subr.bf16.mxu0 (!%p914_p2), %v1104_v1  ;;  %v1107_v4 = vld [vmem:[%s1550_s20 + $0x8] sm:$0xff] (!%p914_p2)   ;;  %v1109_v6 = vld [vmem:[%s1550_s20 + $0x10] sm:$0xff] (!%p914_p2)  }
  0x7e   : > { %953 = vmatpush3.bf16.msra.mxu0 (!%p914_p2), %v1105_v2  ;;  %v1110_v7 = vld [vmem:[%s1550_s20 + $0x58] sm:$0xff] (!%p914_p2)   ;;  %v1112_v9 = vld [vmem:[%s1550_s20 + $0x60] sm:$0xff] (!%p914_p2)   ;;  %v1114_v11 = vld [vmem:[%s1550_s20 + $0x68] sm:$0xff] (!%p914_p2)  }
  0x7f   : > { %954 = vmatprep.subr.bf16.mxu0 (!%p914_p2), %v1106_v3  ;;  %v1111_v8 = vld [vmem:[%s1550_s20 + $0x18] sm:$0xff] (!%p914_p2)   ;;  %v1113_v10 = vld [vmem:[%s1550_s20 + $0x20] sm:$0xff] (!%p914_p2)   ;;  %v1115_v14 = vld [vmem:[%s1550_s20 + $0x28] sm:$0xff] (!%p914_p2)  }
  0x80   : > { %v420_v12 = vld [vmem:[%s1543_s10] sm:$0xff] (!%p914_p2)  ;;  %v419_v21 = vld [vmem:[#allocation2] sm:$0xff] (!%p914_p2) }
  0x81   : > { %v916_v13 = vcombine.high (!%p914_p2), %v420_v12, %v420_v12  ;;  %v1116_v15 = vld [vmem:[%s1550_s20 + $0x70] sm:$0xff] (!%p914_p2)   ;;  %v1118_v17 = vld [vmem:[%s1550_s20 + $0x78] sm:$0xff] (!%p914_p2)   ;;  %v915_v19 = vcombine.low (!%p914_p2), %v420_v12, %v420_v12 }
  0x82   : > { %955 = vmatpush3.bf16.msra.mxu0 (!%p914_p2), %v1107_v4  ;;  %v1117_v16 = vld [vmem:[%s1550_s20 + $0x30] sm:$0xff] (!%p914_p2)   ;;  %v1119_v18 = vld [vmem:[%s1550_s20 + $0x38] sm:$0xff] (!%p914_p2)  }
  0x83   : > { %956 = vmatprep.subr.bf16.mxu0 (!%p914_p2), %v1108_v5  ;;  %588 = vmatprep.mubr.bf16.mxu0 (!%p914_p2), %v916_v13 }
  0x86   : > { %957 = vmatpush3.bf16.msra.mxu0 %v1109_v6 }
  0x87   : > { %958 = vmatprep.subr.bf16.mxu0 %v1110_v7 }
  0x8a   : > { %959 = vmatpush3.bf16.msra.mxu0 %v1111_v8 }
  0x8b   : > { %960 = vmatprep.subr.bf16.mxu0 %v1112_v9 }
  0x8e   : > { %961 = vmatpush3.bf16.msra.mxu0 %v1113_v10 }
  0x8f   : > { %962 = vmatprep.subr.bf16.mxu0 %v1114_v11 }
  0x92   : > { %963 = vmatpush3.bf16.msra.mxu0 %v1115_v14 }
  0x93   : > { %964 = vmatprep.subr.bf16.mxu0 %v1116_v15 }
  0x96   : > { %965 = vmatpush3.bf16.msra.mxu0 %v1117_v16 }
  0x97   : > { %966 = vmatprep.subr.bf16.mxu0 %v1118_v17 }
  0x9a   : > { %967 = vmatpush3.bf16.msra.mxu0 %v1119_v18 }
  0x9d   : > { %589 = vmatmul.mubr.bf16.vlgmr.msra.gmra.mrb[0].mxu0 %v915_v19 }
 0x170   : > { %v968_v20 = vpop.f32.mrb[0].mxu0 }
 0x171   : > { %v969_v22 = vpop.f32.mrb[1].mxu0 }
 0x172   : > { %v970_v23 = vadd.f32 %v969_v22, %v968_v20  ;;  %v971_v24 = vpop.f32.mrb[2].mxu0 }
 0x173   : > { %v972_v25 = vpop.f32.mrb[3].mxu0 }
 0x174   : > { %v596_v26 = vadd.f32 %v970_v23, %v419_v21 }
 0x176   : > { %597 = vst [vmem:[#allocation2] sm:$0xff] %v596_v26 }
 0x177 PF: > { %600 = sbr.rel (%p913_p4) target bundleno = 387 (0x183), region = 64  ;;  %v934_v28 = vld [vmem:[%s1658_s2] ss:$0 sm:$0xff] (!%p913_p4) }
 0x17d   : > { %v601_v27 = vld [vmem:[#allocation2] sm:$0xff] (!%p913_p4) }
 0x17e   : > { %v609_v29 = vadd.f32 %v934_v28, %v601_v27 }
 0x180   : > { %v610_v30 = vmax.f32 %v609_v29, 0.0 }
 0x182   : > { %611 = vst [vmem:[#allocation2] sm:$0xff] %v610_v30 }
 0x183 PF: > { %p935_p8 = scmp.lt.s32.totalorder %s1320_s22, 1 }
 0x184   : > { %v1122_v31 = vld [vmem:[%s1560_s28] sm:$0xff] (!%p935_p8)   ;;  %v1336_v32 = vmov (!%p935_p8), 0.0   ;;  %v1123_v33 = vld [vmem:[%s1560_s28 + $0x8] sm:$0xff] (!%p935_p8)   ;;  %vm1337_vm0 = vmmov (!%p935_p8), 0   ;;  %v1124_v34 = vld [vmem:[%s1560_s28 + $0x10] sm:$0xff] (!%p935_p8)  }
 0x185   : > { %615 = sbr.rel (%p935_p8) target bundleno = 638 (0x27e), region = 68  ;;  %983 = vmatprep.subr.bf16.mxu0 (!%p935_p8), %v1336_v32  ;;  %999 = vmatprep.mubr.msk.bf16.mxu0 (!%p935_p8), %vm1337_vm0, %v1336_v32  ;;  %v1125_v35 = vld [vmem:[%s1560_s28 + $0x18] sm:$0xff] (!%p935_p8)   ;;  %v1126_v36 = vld [vmem:[%s1560_s28 + $0x20] sm:$0xff] (!%p935_p8)   ;;  %v1127_v37 = vld [vmem:[%s1560_s28 + $0x28] sm:$0xff] (!%p935_p8)  }
 0x186   : > { %984 = vmatpush3.bf16.msra.mxu0 (!%p935_p8), %v1122_v31  ;;  %v1128_v38 = vld [vmem:[%s1560_s28 + $0x30] sm:$0xff] (!%p935_p8)   ;;  %v1129_v39 = vld [vmem:[%s1560_s28 + $0x38] sm:$0xff] (!%p935_p8)   ;;  %v936_v42 = vld [vmem:[%s1660_s4] ss:$0 sm:$0xff] (!%p935_p8) }
 0x187   : > { %985 = vmatprep.subr.bf16.mxu0 (!%p935_p8), %v1336_v32 }
 0x189   : > { %v616_v40 = vld [vmem:[#allocation2] sm:$0xff] (!%p935_p8) }
 0x18a   : > { %986 = vmatpush3.bf16.msra.mxu0 (!%p935_p8), %v1123_v33  ;;  %v617_v41 = vpack.c.bf16 (!%p935_p8), %v616_v40, %v616_v40 }
 0x18b   : > { %987 = vmatprep.subr.bf16.mxu0 (!%p935_p8), %v1336_v32 }
 0x18e   : > { %988 = vmatpush3.bf16.msra.mxu0 %v1124_v34 }
 0x18f   : > { %989 = vmatprep.subr.bf16.mxu0 %v1336_v32 }
 0x192   : > { %990 = vmatpush3.bf16.msra.mxu0 %v1125_v35 }
 0x193   : > { %991 = vmatprep.subr.bf16.mxu0 %v1336_v32 }
 0x196   : > { %992 = vmatpush3.bf16.msra.mxu0 %v1126_v36 }
 0x197   : > { %993 = vmatprep.subr.bf16.mxu0 %v1336_v32 }
 0x19a   : > { %994 = vmatpush3.bf16.msra.mxu0 %v1127_v37 }
 0x19b   : > { %995 = vmatprep.subr.bf16.mxu0 %v1336_v32 }
 0x19e   : > { %996 = vmatpush3.bf16.msra.mxu0 %v1128_v38 }
 0x19f   : > { %997 = vmatprep.subr.bf16.mxu0 %v1336_v32 }
 0x1a2   : > { %998 = vmatpush3.bf16.msra.mxu0 %v1129_v39 }
 0x1a5   : > { %1000 = vmatmul.mubr.bf16.vlgmr.msra.gmra.mrb[0].mxu0 %v617_v41 }
 0x278   : > { %v723_v43 = vpop.f32.mrb[0].mxu0 }
 0x279   : > { %v724_v44 = vadd.f32 %v936_v42, %v723_v43  ;;  %v1001_v45 = vpop.f32.mrb[1].mxu0 }
 0x27a   : > { %v726_v46 = vpop.f32.mrb[2].mxu0 }
 0x27b   : > { %v729_v47 = vmax.f32 %v724_v44, 0.0  ;;  %v1002_v48 = vpop.f32.mrb[3].mxu0 }
 0x27d   : > { %730 = vst [vmem:[%s1567_s30] sm:$0xff] %v729_v47 }
 0x27e PF: > { %s946_s17 = sadd.s32 4294967295, %s1320_s22  ;;  %s749_s12 = sshll.u32 %s1567_s30, 4  ;;  %s1610_s12 = int_to_ptr.vmem [resolvable:$true] %s749_s12 }
 0x27f   : > { %p740_p0 = scmp.gt.s32.totalorder %s946_s17, 0  ;;  %s732_s20 = scalar_lea.sflag [#allocation5], %s1557_s8 }
 0x280   : > { %s1220_s15 = scalar_lea.vmem %s1610_s12, 128  ;;  %p1686_p1 = scmp.ne.s32.totalorder %s1677_s13, 0 }
 0x281   : > { %s1696_s17 = smov (!%p740_p0, %s946_s17), 0  ;;  %p1221_p7 = scmp.ne.s32.totalorder %s1610_s12, %s1220_s15 }
 0x282   : > { %s947_s10 = sshll.u32 %s1696_s17, 7  ;;  %s1338_s22 = smov [#allocation9]  }
 0x283   : > { %s747_s7 = scalar_lea.hbm %s1661_s5, %s947_s10  ;;  %p1222_p3 = pnand %p1221_p7, %p1686_p1 }
 0x284   : > { %s1224_s28 = sshll.u32 %s1338_s22, 4  ;;  %s1225_s28 = int_to_ptr.vmem [resolvable:$false] %s1224_s28 }
 0x285   : > { %p1223_p13 = pneg %p1222_p3  ;;  %s1226_s25 = scalar_lea.vmem %s1225_s28, 256 }
 0x286   : > { %p1227_p9 = scmp.lt.s32.totalorder %s1610_s12, %s1225_s28  ;;  %p1228_p6 = scmp.lt.s32.totalorder %s1226_s25, %s1220_s15 }
 0x288   : > { %p1229_p12 = por %p1228_p6, %p1227_p9 }
 0x28a   : > { %p1230_p10 = pnand %p1229_p12, %p1223_p13 }
 0x28c   : > { %1233 = shalt.err (!%p1230_p10)
}
 0x28d   : > { %s1234_s30 = scalar_lea.hbm %s747_s7, 128  ;;  %s1238_s29 = scalar_lea.hbm %s1661_s5, 128 }
 0x28e   : > { %p1235_p5 = scmp.ne.s32.totalorder %s747_s7, %s1234_s30  ;;  %p1239_p2 = scmp.lt.u32.totalorder %s747_s7, %s1661_s5 }
 0x28f   : > { %p1240_p8 = scmp.lt.u32.totalorder %s1238_s29, %s1234_s30  ;;  %p1242_p7 = scmp.lt.u32.totalorder %s1234_s30, %s747_s7 }
 0x290   : > { %p1236_p11 = pnand %p1235_p5, %p1686_p1 }
 0x291   : > { %p1241_p0 = por %p1240_p8, %p1239_p2 }
 0x292   : > { %p1237_p4 = pneg %p1236_p11 }
 0x293   : > { %p1243_p3 = por %p1242_p7, %p1241_p0 }
 0x295   : > { %p1244_p13 = pnand %p1243_p3, %p1237_p4 }
 0x297   : > { %1247 = shalt.err (!%p1244_p13)
}
 0x298   : > { %1009 = dma.vmem_to_hbm [thread:$0]  (%p1686_p1), %s1610_s12, 128, %s747_s7, %s732_s20  }
 0x299 PF: > { %s761_s17 = sand.u32 1, %s1304_s18   ;;  %p1687_p9 = scmp.ne.s32.totalorder %s1678_s14, 0 }
 0x29a   : > { %p1688_p6 = scmp.ge.s32.totalorder %s1328_s24, 2  ;;  %s762_s10 = scalar_lea.sflag [#allocation5], %s761_s17 }
 0x29c   : > { %p1022_p12 = pnand %p1688_p6, %p1687_p9 }
 0x29e   : > { %1297 = dma.done.wait (!%p1022_p12), %s762_s10, 128  }
 0x29f   : > { %1299 = vsyncadd (!%p1022_p12), %s762_s10, 4294967168  ;;  %s24_s24 = sadd.s32 1, %s1328_s24   ;;  %s1689_s18 = smov %s1308_s19 }
 0x2a0   : > { %p21_p10 = scmp.ge.s32.totalorder %s24_s24, 4   ;;  %s1641_s19 = smov 0  }
 0x2a1   : > { %s1690_s20 = smov %s1316_s21  ;;  %s1646_s21 = smov 0  }
 0x2a2   : > { %s1691_s22 = smov %s1324_s23  ;;  %s1692_s23 = smov %s1694_s26 }
 0x2a3   :  { %23 = sbr.rel (!%p21_p10) target bundleno = 9 (0x9), region = 128 }
 0x2aa   :  { %767 = vsyncpa [#allocation4], 1 }
 0x2ab   :  { %769 = vsyncpa [#allocation4 + $0x1], 1 }
 0x2ac   :  { %770 = vsyncpa [#allocation7], 1 }
 0x2ad   :  { %772 = vsyncpa [#allocation7 + $0x1], 1 }
 0x2ae   :  { %773 = vsyncpa [#allocation5], 1 }
 0x2af   :  { %775 = vsyncpa [#allocation5 + $0x1], 1 }

</bundles_post_ra>
